<compile_context>
chip_gen: v7x
topology: tpu7x:2x2x1
jax: 0.10.0
libtpu: 0.0.40
codegen_flags: <defaults>
</compile_context>

<pallas_src>
import jax
import jax.numpy as jnp
from jax.experimental import pallas as pl
from jax.experimental.pallas import tpu as pltpu


def _rowsum_kernel(t_ref, w_ref, o_ref):
    # t_ref: (tile_rows, width), w_ref: (width, out_cols), o_ref: f32 block.
    # Row-wise weighted reduction on the MXU with f32 accumulation.
    o_ref[...] = jnp.dot(
        t_ref[...], w_ref[...], preferred_element_type=jnp.float32
    )


def _vmem_budget():
    """(per-tile byte budget, scoped-VMEM limit) chosen per TPU generation."""
    try:
        cap = int(getattr(pltpu.get_tpu_info(), "vmem_capacity_bytes"))
    except Exception:
        cap = 64 * 1024 * 1024  # unknown -> assume smallest (v7x per-TC)
    if cap >= 96 * 1024 * 1024:
        # v5e / v6e: 128 MiB physical VMEM. Large tiles amortize the ~0.35us
        # per-grid-step overhead; raise the scoped limit for 2x double buffers.
        return 16 * 1024 * 1024, 80 * 1024 * 1024
    # v7x: 64 MiB per TensorCore. Keep total live VMEM (2 x tile + theta + out)
    # well under ~48 MiB.
    return 12 * 1024 * 1024, 48 * 1024 * 1024


def linear_model_forward(t, theta):
    """LinearModel.forward: sum(t * theta, axis=1, keepdims=True) -> (N, 1) f32."""
    N, D = t.shape
    theta_vec = jnp.reshape(theta, (D,)).astype(jnp.float32)
    itemsize = jnp.dtype(t.dtype).itemsize
    pack = max(8, 32 // itemsize)  # dtype-aware sublane multiple

    # ---- small-D lane packing (free, contiguous reshapes on both ends) ----
    r = 128 // D if (D < 128 and 128 % D == 0) else 1
    if r > 1 and N % r == 0:
        n_rows, width, out_cols = N // r, r * D, r
        t2 = jnp.reshape(t, (n_rows, width))                       # no copy
        # Block-diagonal weights: w[k*D + d, k] = theta[d]
        w = (jnp.eye(r, dtype=jnp.float32)[:, None, :]
             * theta_vec[None, :, None]).reshape(width, r)
    else:
        n_rows, width, out_cols = N, D, 1
        t2 = t
        w = theta_vec.reshape(D, 1)

    # ---- tile sizing by bytes (no hard row cap) ----
    tile_budget, vmem_limit = _vmem_budget()
    row_bytes = max(1, width * itemsize)
    rows_by_budget = max(pack, (tile_budget // row_bytes) // pack * pack)
    # One full-extent block if it fits, else a pack-multiple tile; the last
    # block may be partial (Pallas masks OOB reads/writes -- no padding pass).
    tile_rows = n_rows if rows_by_budget >= n_rows else rows_by_budget
    grid = (pl.cdiv(n_rows, tile_rows),)

    out = pl.pallas_call(
        _rowsum_kernel,
        out_shape=jax.ShapeDtypeStruct((n_rows, out_cols), jnp.float32),
        grid=grid,
        in_specs=[
            pl.BlockSpec((tile_rows, width), lambda i: (i, 0)),
            pl.BlockSpec((width, out_cols), lambda i: (0, 0)),
        ],
        out_specs=pl.BlockSpec((tile_rows, out_cols), lambda i: (i, 0)),
        compiler_params=pltpu.CompilerParams(
            dimension_semantics=("parallel",),
            vmem_limit_bytes=vmem_limit,
        ),
        cost_estimate=pl.CostEstimate(
            flops=2 * N * D,
            transcendentals=0,
            bytes_accessed=itemsize * N * D + 4 * D + 4 * N,
        ),
    )(t2, w)

    return jnp.reshape(out, (N, 1))  # contiguous -> no copy


if __name__ == "__main__":
    key = jax.random.PRNGKey(0)

    # Small shapes consistent with the module: batch=8, dim_theta=32.
    N, D = 8, 32
    t = jax.random.normal(key, (N, D), dtype=jnp.float32)
    # Deterministic parameter init, matching nn.Parameter([[0.5] * dim_theta])
    theta = jnp.full((1, D), 0.5, dtype=jnp.float32)

    out = jax.block_until_ready(linear_model_forward(t, theta))
    ref = jnp.sum(t * theta.reshape(1, -1), axis=1, keepdims=True).astype(jnp.float32)
    assert out.shape == (N, 1) and out.dtype == jnp.float32
    assert jnp.allclose(out, ref, atol=1e-5, rtol=1e-5)

    # Also exercise the un-packed fallbacks (N not a multiple of 128//D, D>=128)
    # so both BlockSpec configurations are verified to lower and run.
    for (n2, d2) in [(7, 32), (16, 256)]:
        k2 = jax.random.fold_in(key, n2 * 1000 + d2)
        t2 = jax.random.normal(k2, (n2, d2), dtype=jnp.float32)
        th2 = jnp.full((1, d2), 0.5, dtype=jnp.float32)
        o2 = jax.block_until_ready(linear_model_forward(t2, th2))
        r2 = jnp.sum(t2 * th2.reshape(1, -1), axis=1, keepdims=True).astype(jnp.float32)
        assert o2.shape == (n2, 1) and jnp.allclose(o2, r2, atol=1e-4, rtol=1e-4)

    print("KERNEL_OK")
</pallas_src>

<mosaic_0001>
module attributes {stable_mosaic.version = 11 : i64} {
  func.func @_rowsum_kernel(%arg0: i32, %arg1: memref<2x128xf32, #tpu.memory_space<vmem>>, %arg2: memref<128x4xf32, #tpu.memory_space<vmem>>, %arg3: memref<2x4xf32, #tpu.memory_space<vmem>>) attributes {dimension_semantics = [#tpu.dimension_semantics<parallel>], iteration_bounds = array<i64: 1>, scalar_prefetch = 0 : i64, scratch_operands = 0 : i64, tpu.core_type = #tpu.core_type<tc>, window_params = [{transform_indices = @transform_0, window_bounds = array<i64: 2, 128>}, {pipeline_mode = #tpu.pipeline_mode<synchronous>, transform_indices = @transform_1, window_bounds = array<i64: 128, 4>}, {transform_indices = @transform_2, window_bounds = array<i64: 2, 4>}]} {
    %c0 = arith.constant 0 : index
    %c0_0 = arith.constant 0 : index
    %0 = vector.load %arg1[%c0, %c0_0] : memref<2x128xf32, #tpu.memory_space<vmem>>, vector<2x128xf32>
    %c0_1 = arith.constant 0 : index
    %c0_2 = arith.constant 0 : index
    %1 = vector.load %arg2[%c0_1, %c0_2] : memref<128x4xf32, #tpu.memory_space<vmem>>, vector<128x4xf32>
    %cst = arith.constant dense<0.000000e+00> : vector<2x4xf32>
    %2 = tpu.matmul %0, %1, %cst {dimension_numbers = #tpu.dot_dimension_numbers<[1], [0], [0], [1], [0, 0, 1, 1], [], []>} : vector<2x128xf32>, vector<128x4xf32>, vector<2x4xf32> -> vector<2x4xf32>
    %c0_3 = arith.constant 0 : index
    %c0_4 = arith.constant 0 : index
    %3 = vector.load %arg3[%c0_3, %c0_4] : memref<2x4xf32, #tpu.memory_space<vmem>>, vector<2x4xf32>
    tpu.vector_store %arg3[%c0_3, %c0_4], %2 {strides = array<i32>} : memref<2x4xf32, #tpu.memory_space<vmem>>, vector<2x4xf32>,
    return
  }
  func.func @transform_0(%arg0: i32) -> (i32, i32) {
    %c0_i32 = arith.constant 0 : i32
    %c0_i32_0 = arith.constant 0 : i32
    return %arg0, %c0_i32 : i32, i32
  }
  func.func @transform_1(%arg0: i32) -> (i32, i32) {
    %c0_i32 = arith.constant 0 : i32
    %c0_i32_0 = arith.constant 0 : i32
    %c0_i32_1 = arith.constant 0 : i32
    return %c0_i32, %c0_i32_0 : i32, i32
  }
  func.func @transform_2(%arg0: i32) -> (i32, i32) {
    %c0_i32 = arith.constant 0 : i32
    %c0_i32_0 = arith.constant 0 : i32
    return %arg0, %c0_i32 : i32, i32
  }
}

</mosaic_0001>

<bundles_post_ra>
// kernel: tpu_custom_call.1
= control target key start
LH: loop header
LB: loop body
LE: loop exit
PB: predicated region body
PF: predicated region fallthrough
CT: control target
= control target key end

     0   :  { %v219_v3 = vmov 0.0|0.0   ;;  %vm220_vm0 = vmmov 0   ;;  %v221_v6 = vmov 0.0   ;;  %s301_s0 = inlined_call_operand.vmem [shape: f32[2,128], index: 0, kind: input, shape index: {}]   ;;  %s302_s1 = inlined_call_operand.vmem [shape: f32[128,4], index: 1, kind: input, shape index: {}]   ;;  %s303_s2 = inlined_call_operand.hbm [shape: f32[2,4], index: 2, kind: output, shape index: {}]  }
   0x1   :  { %v13_v0 = vld [vmem:[%s302_s1] sm:$0xff]  ;;  %v14_v1 = vld [vmem:[%s302_s1 + $0x8] sm:$0xff]  ;;  %v15_v2 = vld [vmem:[%s302_s1 + $0x10] sm:$0xff]  ;;  %167 = vmatprep.subr.bf16.mxu0 %v219_v3  ;;  %164 = vmatprep.mubr.msk.f32.mxu0 %vm220_vm0, %v221_v6 }
   0x2   :  { %v168_v4 = vpack.c.bf16 %v14_v1, %v13_v0  ;;  %v16_v5 = vld [vmem:[%s302_s1 + $0x18] sm:$0xff]  ;;  %v17_v8 = vld [vmem:[%s302_s1 + $0x20] sm:$0xff]  ;;  %v18_v9 = vld [vmem:[%s302_s1 + $0x28] sm:$0xff] }
   0x3   :  { %v171_v7 = vpack.c.bf16 %v16_v5, %v15_v2 }
   0x4   :  { %169 = vmatpush3.bf16.msra.mxu0 %v168_v4 }
   0x5   :  { %170 = vmatprep.subr.bf16.mxu0 %v219_v3 }
   0x6   :  { %7 = vsyncpa [#allocation3], 0  ;;  %v174_v10 = vpack.c.bf16 %v18_v9, %v17_v8  ;;  %v19_v11 = vld [vmem:[%s302_s1 + $0x30] sm:$0xff]  ;;  %v20_v12 = vld [vmem:[%s302_s1 + $0x38] sm:$0xff]  ;;  %s222_s15 = smov [#allocation2]   ;;  %vm99_vm1 = vcmask 25600  }
   0x7   :  { %v177_v13 = vpack.c.bf16 %v20_v12, %v19_v11  ;;  %v21_v14 = vld [vmem:[%s302_s1 + $0x40] sm:$0xff]  ;;  %v22_v15 = vld [vmem:[%s302_s1 + $0x48] sm:$0xff]  ;;  %v23_v17 = vld [vmem:[%s302_s1 + $0x50] sm:$0xff]  ;;  %s107_s16 = sshll.u32 %s222_s15, 4  ;;  %s108_s16 = int_to_ptr.vmem [resolvable:$true] %s107_s16 }
   0x8   :  { %172 = vmatpush3.bf16.msra.mxu0 %v171_v7  ;;  %v180_v16 = vpack.c.bf16 %v22_v15, %v21_v14  ;;  %v24_v18 = vld [vmem:[%s302_s1 + $0x58] sm:$0xff]  ;;  %v25_v20 = vld [vmem:[%s302_s1 + $0x60] sm:$0xff]  ;;  %v26_v21 = vld [vmem:[%s302_s1 + $0x68] sm:$0xff]  ;;  %s195_s17 = scalar_lea.vmem %s108_s16, 32  ;;  %p200_p1 = scmp.lt.s32.totalorder %s108_s16, %s108_s16 }
   0x9   :  { %173 = vmatprep.subr.bf16.mxu0 %v219_v3  ;;  %v183_v19 = vpack.c.bf16 %v24_v18, %v23_v17  ;;  %v186_v22 = vpack.c.bf16 %v26_v21, %v25_v20  ;;  %v27_v23 = vld [vmem:[%s302_s1 + $0x70] sm:$0xff]  ;;  %v28_v24 = vld [vmem:[%s302_s1 + $0x78] sm:$0xff]  ;;  %v12_v26 = vld [vmem:[%s301_s0] sm:$0x3]  ;;  %p196_p0 = scmp.ne.s32.totalorder %s108_s16, %s195_s17  ;;  %p201_p2 = scmp.lt.s32.totalorder %s195_s17, %s195_s17 }
   0xa   :  { %v189_v25 = vpack.c.bf16 %v28_v24, %v27_v23 }
   0xb   :  { %p202_p3 = por %p201_p2, %p200_p1 }
   0xc   :  { %175 = vmatpush3.bf16.msra.mxu0 %v174_v10 }
   0xd   :  { %176 = vmatprep.subr.bf16.mxu0 %v219_v3  ;;  %p203_p4 = pnand %p202_p3, %p196_p0 }
  0x10   :  { %178 = vmatpush3.bf16.msra.mxu0 %v177_v13 }
  0x11   :  { %179 = vmatprep.subr.bf16.mxu0 %v219_v3 }
  0x14   :  { %181 = vmatpush3.bf16.msra.mxu0 %v180_v16 }
  0x15   :  { %182 = vmatprep.subr.bf16.mxu0 %v219_v3 }
  0x18   :  { %184 = vmatpush3.bf16.msra.mxu0 %v183_v19 }
  0x19   :  { %185 = vmatprep.subr.bf16.mxu0 %v219_v3 }
  0x1c   :  { %187 = vmatpush3.bf16.msra.mxu0 %v186_v22 }
  0x1d   :  { %188 = vmatprep.subr.bf16.mxu0 %v219_v3 }
  0x20   :  { %190 = vmatpush3.bf16.msra.mxu0 %v189_v25 }
  0x23   :  { %165 = vmatmul.mubr.f32.vlgmr.msra.gmra.mrb[0].mxu0 %v12_v26 }
  0xf6   :  { %v95_v27 = vpop.f32.mrb[0].mxu0 }
  0xf7   :  { %100 = vst.msk [vmem:[#allocation2] sm:$0x3] %vm99_vm1, %v95_v27  ;;  %v166_v28 = vpop.f32.mrb[1].mxu0 }
  0xf8   :  { %206 = shalt.err (!%p203_p4)
}
  0xf9   :  { %s207_s19 = scalar_lea.hbm %s303_s2, 32 }
  0xfa   :  { %p208_p5 = scmp.ne.s32.totalorder %s303_s2, %s207_s19  ;;  %p211_p6 = scmp.lt.u32.totalorder %s207_s19, %s303_s2 }
  0xfc   :  { %p213_p7 = pnand %p211_p6, %p208_p5 }
  0xfe   :  { %216 = shalt.err (!%p213_p7)
}
  0xff   :  { %110 = dma.vmem_to_hbm [thread:$0]  %s108_s16, 32, %s303_s2, [#allocation3]  }
 0x100   :  { %217 = dma.done.wait [#allocation3], 32  }
 0x101   :  { %218 = vsyncadd [#allocation3], 4294967264 }
 0x102   :  { %114 = vsyncpa [#allocation3], 1 }

</bundles_post_ra>
